<compile_context>
chip_gen: v6e
topology: v6e:2x2x1
jax: 0.10.0
libtpu: 0.0.40
codegen_flags: <defaults>
</compile_context>

<pallas_src>
import math

import jax
import jax.numpy as jnp
from jax.experimental import pallas as pl
from jax.experimental.pallas import tpu as pltpu


def _critic_kernel(x_ref,
                   w1_ref, b1_ref, w2_ref, b2_ref, w3_ref, b3_ref,
                   q_all_ref, std_ref):
    """Both Q-heads in one invocation; everything VMEM-resident (<1 MiB)."""
    x = x_ref[...]                                    # (B, D_in), bf16
    x2 = jnp.broadcast_to(x, (2,) + x.shape)          # (2, B, D_in), bf16

    # layer 1 (both heads): bf16 x bf16 -> f32 accumulate on the MXU
    h = jnp.einsum('ebi,eio->ebo', x2, w1_ref[...],
                   preferred_element_type=jnp.float32)
    h = jnp.maximum(h + b1_ref[...], 0.0)             # f32 VPU bias + ReLU
    h = h.astype(jnp.bfloat16)

    # layer 2 (both heads)
    g = jnp.einsum('ebi,eio->ebo', h, w2_ref[...],
                   preferred_element_type=jnp.float32)
    g = jnp.maximum(g + b2_ref[...], 0.0)             # (2, B, 300), f32

    # layer 3 (out_features == 1): VPU multiply + XLU lane reduction instead
    # of a 1-column MXU pass.
    q = jnp.sum(g * w3_ref[...], axis=-1) + b3_ref[...]   # (2, B), f32

    # lane-dense outputs: (2, B) and (1, B)
    q_all_ref[...] = q
    # torch.std(dim=0, unbiased=False) over a 2-member ensemble == |q1-q2|/2
    std_ref[...] = jnp.abs(q[0:1, :] - q[1:2, :]) * 0.5


def make_ensemble_critic_params(key, state_dim, action_dim):
    """PyTorch-Linear-style init U(-1/sqrt(fan_in), 1/sqrt(fan_in)), packed.

    Returns (w1, b1, w2, b2, w3, b3):
      w1: (2, D_in, 400) bf16   b1: (2, 1, 400) f32
      w2: (2, 400, 300) bf16    b2: (2, 1, 300) f32
      w3: (2, 1, 300)  f32      b3: (2, 1)      f32
    Weights are stored (in_features, out_features) so the kernel computes
    y = x @ W + b (== PyTorch's x @ W.T + b with W pre-transposed).
    """
    d_in = state_dim + action_dim

    def linear(k, fan_in, fan_out):
        kw, kb = jax.random.split(k)
        bound = 1.0 / math.sqrt(fan_in)
        w = jax.random.uniform(kw, (fan_in, fan_out), jnp.float32, -bound, bound)
        b = jax.random.uniform(kb, (fan_out,), jnp.float32, -bound, bound)
        return w, b

    keys = jax.random.split(key, 6)
    w1a, b1a = linear(keys[0], d_in, 400)   # l1
    w2a, b2a = linear(keys[1], 400, 300)    # l2
    w3a, b3a = linear(keys[2], 300, 1)      # l3
    w1b, b1b = linear(keys[3], d_in, 400)   # l4
    w2b, b2b = linear(keys[4], 400, 300)    # l5
    w3b, b3b = linear(keys[5], 300, 1)      # l6

    w1 = jnp.stack([w1a, w1b]).astype(jnp.bfloat16)           # (2, D_in, 400)
    b1 = jnp.stack([b1a, b1b])[:, None, :]                    # (2, 1, 400) f32
    w2 = jnp.stack([w2a, w2b]).astype(jnp.bfloat16)           # (2, 400, 300)
    b2 = jnp.stack([b2a, b2b])[:, None, :]                    # (2, 1, 300) f32
    w3 = jnp.stack([w3a, w3b]).transpose(0, 2, 1)             # (2, 1, 300) f32
    b3 = jnp.stack([b3a, b3b])                                # (2, 1) f32
    return (w1, b1, w2, b2, w3, b3)


def ensemble_critic_forward(state, action, params, with_var=False):
    """JAX wrapper reproducing EnsembleCritic.forward semantics."""
    x = jnp.concatenate([state, action], axis=1).astype(jnp.bfloat16)
    B = x.shape[0]
    w1, b1, w2, b2, w3, b3 = params

    vmem = pl.BlockSpec(memory_space=pltpu.MemorySpace.VMEM)

    q_all_2d, std_2d = pl.pallas_call(
        _critic_kernel,
        out_shape=(
            jax.ShapeDtypeStruct((2, B), jnp.float32),   # lane-dense (2, B)
            jax.ShapeDtypeStruct((1, B), jnp.float32),   # lane-dense (1, B)
        ),
        in_specs=[vmem] * 7,
        out_specs=(vmem, vmem),
    )(x, w1, b1, w2, b2, w3, b3)

    q_all = q_all_2d[:, :, None]          # (2, B, 1) -- PyTorch layout
    if with_var:
        std_q = std_2d.reshape(B, 1)      # (B, 1)
        return q_all, std_q
    return q_all


def _reference_mimic(state, action, params):
    """Pure-JAX reference reproducing the kernel's bf16 casts exactly."""
    w1, b1, w2, b2, w3, b3 = params
    x = jnp.concatenate([state, action], axis=1)
    x = x.astype(jnp.bfloat16).astype(jnp.float32)
    x2 = jnp.broadcast_to(x, (2,) + x.shape)
    h = jax.nn.relu(jnp.einsum('ebi,eio->ebo', x2, w1.astype(jnp.float32)) + b1)
    h = h.astype(jnp.bfloat16).astype(jnp.float32)
    g = jax.nn.relu(jnp.einsum('ebi,eio->ebo', h, w2.astype(jnp.float32)) + b2)
    q = jnp.sum(g * w3, axis=-1) + b3
    q_all = q[:, :, None]
    std_q = jnp.std(q_all, axis=0)
    return q_all, std_q


def _reference_f32(state, action, params):
    """Module semantics in pure f32 with the stored parameter values."""
    w1, b1, w2, b2, w3, b3 = [p.astype(jnp.float32) for p in params]
    x = jnp.concatenate([state, action], axis=1).astype(jnp.float32)
    x2 = jnp.broadcast_to(x, (2,) + x.shape)
    h = jax.nn.relu(jnp.einsum('ebi,eio->ebo', x2, w1) + b1)
    g = jax.nn.relu(jnp.einsum('ebi,eio->ebo', h, w2) + b2)
    q = jnp.sum(g * w3, axis=-1) + b3
    q_all = q[:, :, None]
    std_q = jnp.std(q_all, axis=0)
    return q_all, std_q


if __name__ == "__main__":
    key = jax.random.PRNGKey(0)
    batch, state_dim, action_dim = 8, 12, 4

    k_params, k_state, k_action = jax.random.split(key, 3)
    params = make_ensemble_critic_params(k_params, state_dim, action_dim)
    state = jax.random.normal(k_state, (batch, state_dim), jnp.float32)
    action = jax.random.normal(k_action, (batch, action_dim), jnp.float32)

    q_all, std_q = ensemble_critic_forward(state, action, params, with_var=True)
    q_all = jax.block_until_ready(q_all)
    std_q = jax.block_until_ready(std_q)

    assert q_all.shape == (2, batch, 1)
    assert std_q.shape == (batch, 1)

    # tight check vs. a reference that mimics the kernel's bf16 casts
    q_m, s_m = _reference_mimic(state, action, params)
    assert jnp.allclose(q_all, q_m, atol=2e-3, rtol=2e-3)
    assert jnp.allclose(std_q, s_m, atol=2e-3, rtol=2e-3)

    # loose check vs. pure-f32 module semantics (bf16 activation casts only)
    q_f, s_f = _reference_f32(state, action, params)
    assert jnp.allclose(q_all, q_f, atol=5e-2, rtol=5e-2)
    assert jnp.allclose(std_q, s_f, atol=5e-2, rtol=5e-2)

    # with_var=False path
    q_only = jax.block_until_ready(
        ensemble_critic_forward(state, action, params, with_var=False))
    assert q_only.shape == (2, batch, 1)
    assert jnp.allclose(q_only, q_all, atol=0, rtol=0)

    print("KERNEL_OK")
</pallas_src>

<mosaic_0001>
module attributes {stable_mosaic.version = 11 : i64} {
  func.func @_critic_kernel(%arg0: memref<8x16xbf16, #tpu.memory_space<vmem>>, %arg1: memref<2x16x400xbf16, #tpu.memory_space<vmem>>, %arg2: memref<2x1x400xf32, #tpu.memory_space<vmem>>, %arg3: memref<2x400x300xbf16, #tpu.memory_space<vmem>>, %arg4: memref<2x1x300xf32, #tpu.memory_space<vmem>>, %arg5: memref<2x1x300xf32, #tpu.memory_space<vmem>>, %arg6: memref<2x1xf32, #tpu.memory_space<vmem>>, %arg7: memref<2x8xf32, #tpu.memory_space<vmem>>, %arg8: memref<1x8xf32, #tpu.memory_space<vmem>>) attributes {dimension_semantics = [], scalar_prefetch = 0 : i64, scratch_operands = 0 : i64, tpu.core_type = #tpu.core_type<tc>} {
    %c0 = arith.constant 0 : index
    %c0_0 = arith.constant 0 : index
    %0 = vector.load %arg0[%c0, %c0_0] : memref<8x16xbf16, #tpu.memory_space<vmem>>, vector<8x16xbf16>
    %1 = vector.shape_cast %0 : vector<8x16xbf16> to vector<1x8x16xbf16>
    %2 = vector.broadcast %1 : vector<1x8x16xbf16> to vector<2x8x16xbf16>
    %c0_1 = arith.constant 0 : index
    %c0_2 = arith.constant 0 : index
    %c0_3 = arith.constant 0 : index
    %3 = vector.load %arg1[%c0_1, %c0_2, %c0_3] : memref<2x16x400xbf16, #tpu.memory_space<vmem>>, vector<2x16x400xbf16>
    "tpu.trace_start"() <{level = 10 : i32, message = "ebi,eio->ebo"}> : () -> ()
    %cst = arith.constant dense<0.000000e+00> : vector<2x8x400xf32>
    %4 = tpu.matmul %2, %3, %cst {dimension_numbers = #tpu.dot_dimension_numbers<[2], [1], [1], [2], [0, 0, 0, 1, 1, 2], [0], [0]>} : vector<2x8x16xbf16>, vector<2x16x400xbf16>, vector<2x8x400xf32> -> vector<2x8x400xf32>
    "tpu.trace_stop"() : () -> ()
    %c0_4 = arith.constant 0 : index
    %c0_5 = arith.constant 0 : index
    %c0_6 = arith.constant 0 : index
    %5 = vector.load %arg2[%c0_4, %c0_5, %c0_6] : memref<2x1x400xf32, #tpu.memory_space<vmem>>, vector<2x1x400xf32>
    %6 = vector.broadcast %5 : vector<2x1x400xf32> to vector<2x8x400xf32>
    %7 = arith.addf %4, %6 : vector<2x8x400xf32>
    %cst_7 = arith.constant 0.000000e+00 : f32
    %8 = vector.broadcast %cst_7 : f32 to vector<2x8x400xf32>
    %9 = arith.maximumf %7, %8 : vector<2x8x400xf32>
    %10 = arith.truncf %9 : vector<2x8x400xf32> to vector<2x8x400xbf16>
    %c0_8 = arith.constant 0 : index
    %c0_9 = arith.constant 0 : index
    %c0_10 = arith.constant 0 : index
    %11 = vector.load %arg3[%c0_8, %c0_9, %c0_10] : memref<2x400x300xbf16, #tpu.memory_space<vmem>>, vector<2x400x300xbf16>
    "tpu.trace_start"() <{level = 10 : i32, message = "ebi,eio->ebo"}> : () -> ()
    %cst_11 = arith.constant dense<0.000000e+00> : vector<2x8x300xf32>
    %12 = tpu.matmul %10, %11, %cst_11 {dimension_numbers = #tpu.dot_dimension_numbers<[2], [1], [1], [2], [0, 0, 0, 1, 1, 2], [0], [0]>} : vector<2x8x400xbf16>, vector<2x400x300xbf16>, vector<2x8x300xf32> -> vector<2x8x300xf32>
    "tpu.trace_stop"() : () -> ()
    %c0_12 = arith.constant 0 : index
    %c0_13 = arith.constant 0 : index
    %c0_14 = arith.constant 0 : index
    %13 = vector.load %arg4[%c0_12, %c0_13, %c0_14] : memref<2x1x300xf32, #tpu.memory_space<vmem>>, vector<2x1x300xf32>
    %14 = vector.broadcast %13 : vector<2x1x300xf32> to vector<2x8x300xf32>
    %15 = arith.addf %12, %14 : vector<2x8x300xf32>
    %cst_15 = arith.constant 0.000000e+00 : f32
    %16 = vector.broadcast %cst_15 : f32 to vector<2x8x300xf32>
    %17 = arith.maximumf %15, %16 : vector<2x8x300xf32>
    %c0_16 = arith.constant 0 : index
    %c0_17 = arith.constant 0 : index
    %c0_18 = arith.constant 0 : index
    %18 = vector.load %arg5[%c0_16, %c0_17, %c0_18] : memref<2x1x300xf32, #tpu.memory_space<vmem>>, vector<2x1x300xf32>
    %19 = vector.broadcast %18 : vector<2x1x300xf32> to vector<2x8x300xf32>
    %20 = arith.mulf %17, %19 : vector<2x8x300xf32>
    %cst_19 = arith.constant dense<0.000000e+00> : vector<2x8xf32>
    %21 = vector.multi_reduction <add>, %20, %cst_19 [2] : vector<2x8x300xf32> to vector<2x8xf32>
    %c0_20 = arith.constant 0 : index
    %c0_21 = arith.constant 0 : index
    %22 = vector.load %arg6[%c0_20, %c0_21] : memref<2x1xf32, #tpu.memory_space<vmem>>, vector<2x1xf32>
    %23 = vector.broadcast %22 : vector<2x1xf32> to vector<2x8xf32>
    %24 = arith.addf %21, %23 : vector<2x8xf32>
    %c0_22 = arith.constant 0 : index
    %c0_23 = arith.constant 0 : index
    %25 = vector.load %arg7[%c0_22, %c0_23] : memref<2x8xf32, #tpu.memory_space<vmem>>, vector<2x8xf32>
    tpu.vector_store %arg7[%c0_22, %c0_23], %24 {strides = array<i32>} : memref<2x8xf32, #tpu.memory_space<vmem>>, vector<2x8xf32>,
    %26 = vector.extract_strided_slice %24 {offsets = [0, 0], sizes = [1, 8], strides = [1, 1]} : vector<2x8xf32> to vector<1x8xf32>
    %27 = vector.extract_strided_slice %24 {offsets = [1, 0], sizes = [1, 8], strides = [1, 1]} : vector<2x8xf32> to vector<1x8xf32>
    %28 = arith.subf %26, %27 : vector<1x8xf32>
    %29 = math.absf %28 : vector<1x8xf32>
    %cst_24 = arith.constant 5.000000e-01 : f32
    %30 = vector.broadcast %cst_24 : f32 to vector<1x8xf32>
    %31 = arith.mulf %29, %30 : vector<1x8xf32>
    %c0_25 = arith.constant 0 : index
    %c0_26 = arith.constant 0 : index
    %32 = vector.load %arg8[%c0_25, %c0_26] : memref<1x8xf32, #tpu.memory_space<vmem>>, vector<1x8xf32>
    tpu.vector_store %arg8[%c0_25, %c0_26], %31 {strides = array<i32>} : memref<1x8xf32, #tpu.memory_space<vmem>>, vector<1x8xf32>,
    return
  }
}

</mosaic_0001>

<bundles_post_ra>
// kernel: tpu_custom_call.1
= control target key start
LH: loop header
LB: loop body
LE: loop exit
PB: predicated region body
PF: predicated region fallthrough
CT: control target
= control target key end

     0   :  { %14 = vsyncpa [#allocation3], 0  ;;  %s2630_s0 = inlined_call_operand.hbm [shape: bf16[8,16], index: 0, kind: input, shape index: {}]   ;;  %s2631_s1 = inlined_call_operand.hbm [shape: bf16[2,16,400], index: 1, kind: input, shape index: {}]   ;;  %s2632_s2 = inlined_call_operand.hbm [shape: f32[2,1,400], index: 2, kind: input, shape index: {}]   ;;  %s2633_s3 = inlined_call_operand.hbm [shape: bf16[2,400,300], index: 3, kind: input, shape index: {}]   ;;  %s2634_s4 = inlined_call_operand.vmem [shape: f32[2,1,300], index: 4, kind: input, shape index: {}]   ;;  %s2635_s5 = inlined_call_operand.vmem [shape: f32[2,1,300], index: 5, kind: input, shape index: {}]   ;;  %s2636_s6 = inlined_call_operand.vmem [shape: f32[2,1], index: 6, kind: input, shape index: {}]   ;;  %s2637_s7 = inlined_call_operand.hbm [shape: f32[2,8], index: 7, kind: output, shape index: {0}]   ;;  %s2638_s8 = inlined_call_operand.hbm [shape: f32[1,8], index: 8, kind: output, shape index: {1}]  }
   0x1   :  { %15 = vsyncpa [#allocation6], 0 }
   0x2   :  { %16 = vsyncpa [#allocation9], 0 }
   0x3   :  { %17 = vsyncpa [#allocation4], 0 }
   0x4   :  { %18 = vsyncpa [#allocation12], 0  ;;  %s2434_s27 = smov [#allocation5]  }
   0x5   :  { %s34_s28 = sshll.u32 %s2434_s27, 4  ;;  %s35_s28 = int_to_ptr.vmem [resolvable:$true] %s34_s28 }
   0x6   :  { %s2312_s29 = scalar_lea.vmem %s35_s28, 1024  ;;  %p2317_p1 = scmp.lt.s32.totalorder %s35_s28, %s35_s28 }
   0x7   :  { %p2313_p0 = scmp.ne.s32.totalorder %s35_s28, %s2312_s29  ;;  %p2318_p2 = scmp.lt.s32.totalorder %s2312_s29, %s2312_s29 }
   0x9   :  { %p2319_p3 = por %p2318_p2, %p2317_p1 }
   0xb   :  { %p2320_p4 = pnand %p2319_p3, %p2313_p0 }
   0xd   :  { %2323 = shalt.err (!%p2320_p4)
}
   0xe   :  { %s2435_s30 = smov 256   ;;  %s2436_s9 = smov 16  }
   0xf   :  { %40 = dma.hbm_to_vmem [thread:$0]  %s2631_s1, 1024, %s35_s28, [#allocation6], %s2435_s30, %s2435_s30, %s2436_s9  }
  0x10   :  { %s2437_s12 = smov [#allocation2]   ;;  %s2438_s14 = smov [#allocation7]  }
  0x11   :  { %s25_s13 = sshll.u32 %s2437_s12, 4  ;;  %s46_s15 = sshll.u32 %s2438_s14, 4  ;;  %s26_s13 = int_to_ptr.vmem [resolvable:$true] %s25_s13  ;;  %s47_s15 = int_to_ptr.vmem [resolvable:$true] %s46_s15 }
  0x12   :  { %s2332_s16 = scalar_lea.vmem %s26_s13, 64  ;;  %p2337_p6 = scmp.lt.s32.totalorder %s26_s13, %s26_s13 }
  0x13   :  { %p2333_p5 = scmp.ne.s32.totalorder %s26_s13, %s2332_s16  ;;  %p2338_p7 = scmp.lt.s32.totalorder %s2332_s16, %s2332_s16 }
  0x15   :  { %p2339_p8 = por %p2338_p7, %p2337_p6 }
  0x17   :  { %p2340_p9 = pnand %p2339_p8, %p2333_p5 }
  0x19   :  { %2343 = shalt.err (!%p2340_p9)
}
  0x1a   :  { %28 = dma.hbm_to_vmem [thread:$0]  %s2630_s0, 64, %s26_s13, [#allocation3]  }
  0x1b   :  { %s2352_s19 = scalar_lea.vmem %s47_s15, 128  ;;  %p2357_p11 = scmp.lt.s32.totalorder %s47_s15, %s47_s15 }
  0x1c   :  { %p2353_p10 = scmp.ne.s32.totalorder %s47_s15, %s2352_s19  ;;  %p2358_p12 = scmp.lt.s32.totalorder %s2352_s19, %s2352_s19 }
  0x1e   :  { %p2359_p13 = por %p2358_p12, %p2357_p11 }
  0x20   :  { %p2360_p0 = pnand %p2359_p13, %p2353_p10 }
  0x22   :  { %2363 = shalt.err (!%p2360_p0)
}
  0x23   :  { %s2439_s1 = smov 64   ;;  %s2440_s20 = smov 4  }
  0x24   :  { %52 = dma.hbm_to_vmem [thread:$0]  %s2632_s2, 128, %s47_s15, [#allocation6], %s2439_s1, %s2439_s1, %s2440_s20  }
  0x25   :  { %s2441_s23 = smov [#allocation8]  }
  0x26   :  { %s58_s24 = sshll.u32 %s2441_s23, 4  ;;  %s59_s24 = int_to_ptr.vmem [resolvable:$true] %s58_s24 }
  0x27   :  { %s2372_s25 = scalar_lea.vmem %s59_s24, 19200  ;;  %p2377_p2 = scmp.lt.s32.totalorder %s59_s24, %s59_s24 }
  0x28   :  { %p2373_p1 = scmp.ne.s32.totalorder %s59_s24, %s2372_s25  ;;  %p2378_p3 = scmp.lt.s32.totalorder %s2372_s25, %s2372_s25 }
  0x2a   :  { %p2379_p4 = por %p2378_p3, %p2377_p2 }
  0x2c   :  { %p2380_p5 = pnand %p2379_p4, %p2373_p1 }
  0x2e   :  { %2383 = shalt.err (!%p2380_p5)
}
  0x2f   :  { %s2442_s0 = smov 192   ;;  %s2443_s26 = smov 12  }
  0x30   :  { %64 = dma.hbm_to_vmem [thread:$0]  %s2633_s3, 19200, %s59_s24, [#allocation9], %s2442_s0, %s2442_s0, %s2443_s26  }
  0x31   :  { %2424 = dma.done.wait [#allocation3], 64  }
  0x32   :  { %2425 = vsyncadd [#allocation3], 4294967232 }
  0x33   :  { %2426 = dma.done.wait [#allocation6], 1152  }
  0x34   :  { %2427 = vsyncadd [#allocation6], 4294966144 }
  0x35   :  { %2428 = dma.done.wait [#allocation9], 19200  }
  0x36   :  { %2429 = vsyncadd [#allocation9], 4294948096  ;;  %v2444_v0 = vmov 0   ;;  %v2092_v1 = vld [vmem:[#allocation5 + $0x4] ss:$16 sps:$4 sm:$0xff]   ;;  %vm157_vm0 = vcmask 130048   ;;  %v97_v61 = vlaneseq }
  0x37   :  { %193 = vmatprep.mubr.bf16.mxu0 %v2444_v0  ;;  %234 = vmatprep.mubr.bf16.mxu1 %v2444_v0  ;;  %v2094_v2 = vld [vmem:[#allocation5 + $0xc] ss:$16 sps:$4 sm:$0xff]   ;;  %v2096_v3 = vld [vmem:[#allocation5] ss:$16 sps:$4 sm:$0xff]   ;;  %v2097_v4 = vld [vmem:[#allocation5 + $0x8] ss:$16 sps:$4 sm:$0xff]  }
  0x38   :  { %2090 = vset.pattern.permute.xlu1 %v2444_v0  ;;  %2091 = vset.pattern.permute.xlu0 %v2444_v0  ;;  %v84_v5 = vld [vmem:[#allocation2] sm:$0xf]  ;;  %v2098_v6 = vld [vmem:[#allocation5 + $0x28] ss:$16 sps:$4 sm:$0xff]   ;;  %v2103_v8 = vld [vmem:[#allocation5 + $0x24] ss:$16 sps:$4 sm:$0xff]  }
  0x39   :  { %175 = vmatprep.subr.bf16.mxu0 %v2092_v1  ;;  %216 = vmatprep.subr.bf16.mxu1 %v2094_v2  ;;  %v2100_v7 = vld [vmem:[#allocation5 + $0x2c] ss:$16 sps:$4 sm:$0xff]   ;;  %v2101_v9 = vld [vmem:[#allocation5 + $0x20] ss:$16 sps:$4 sm:$0xff]   ;;  %v2107_v13 = vld [vmem:[#allocation8 + $0x90] ss:$12 sps:$4 sm:$0xff]  }
  0x3a   :  { %176 = vmatpush1.bf16.msra.mxu0 %v2096_v3  ;;  %217 = vmatpush1.bf16.msra.mxu1 %v2097_v4  ;;  %v2106_v10 = vld [vmem:[#allocation8 + $0xac] ss:$12 sps:$4 sm:$0xff]   ;;  %v2104_v11 = vld [vmem:[#allocation8 + $0xa8] ss:$12 sps:$4 sm:$0xff]   ;;  %v2134_v18 = vld [vmem:[#allocation8 + $0x210] ss:$12 sps:$4 sm:$0xff]  }
  0x3b   :  { %318 = vmatprep.subr.bf16.mxu1 %v2100_v7  ;;  %277 = vmatprep.subr.bf16.mxu0 %v2103_v8  ;;  %v2109_v12 = vld [vmem:[#allocation8 + $0x94] ss:$12 sps:$4 sm:$0xff]   ;;  %v2112_v14 = vld [vmem:[#allocation8 + $0x7c] ss:$12 sps:$4 sm:$0xff]   ;;  %v2130_v16 = vld [vmem:[#allocation8 + $0x22c] ss:$12 sps:$4 sm:$0xff]  }
  0x3c   :  { %v2128_v15 = vld [vmem:[#allocation8 + $0x228] ss:$12 sps:$4 sm:$0xff]   ;;  %v2110_v17 = vld [vmem:[#allocation8 + $0x78] ss:$12 sps:$4 sm:$0xff]   ;;  %v2113_v22 = vld [vmem:[#allocation8 + $0x60] ss:$12 sps:$4 sm:$0xff]  }
  0x3d   :  { %1871 = vmatmul.mubr.msk.bf16.vlgmr.msra.gmra.mxu0 %vm157_vm0, %v84_v5  ;;  %1872 = vmatmul.mubr.msk.bf16.vlgmr.msra.gmra.mxu1 %vm157_vm0, %v84_v5  ;;  %v2136_v19 = vld [vmem:[#allocation8 + $0x214] ss:$12 sps:$4 sm:$0xff]   ;;  %v2115_v20 = vld [vmem:[#allocation8 + $0x64] ss:$12 sps:$4 sm:$0xff]   ;;  %v2142_v21 = vld [vmem:[#allocation8 + $0x1fc] ss:$12 sps:$4 sm:$0xff]  }
  0x3e   :  { %319 = vmatpush1.bf16.msra.mxu1 %v2098_v6  ;;  %336 = vmatprep.mubr.bf16.mxu1 %v2444_v0  ;;  %v2140_v23 = vld [vmem:[#allocation8 + $0x1f8] ss:$12 sps:$4 sm:$0xff]   ;;  %v2116_v26 = vld [vmem:[#allocation8 + $0x48] ss:$12 sps:$4 sm:$0xff]   ;;  %v2146_v27 = vld [vmem:[#allocation8 + $0x1e0] ss:$12 sps:$4 sm:$0xff]  }
  0x3f   :  { %295 = vmatprep.mubr.bf16.mxu0 %v2444_v0  ;;  %278 = vmatpush1.bf16.msra.mxu0 %v2101_v9  ;;  %v2118_v24 = vld [vmem:[#allocation8 + $0x4c] ss:$12 sps:$4 sm:$0xff]   ;;  %v2148_v25 = vld [vmem:[#allocation8 + $0x1e4] ss:$12 sps:$4 sm:$0xff]   ;;  %v2121_v28 = vld [vmem:[#allocation8 + $0x34] ss:$12 sps:$4 sm:$0xff]  }
  0x40   :  { %998 = vmatprep.subr.bf16.mxu0 %v2106_v10  ;;  %1039 = vmatprep.subr.bf16.mxu1 %v2130_v16  ;;  %v2154_v29 = vld [vmem:[#allocation8 + $0x1cc] ss:$12 sps:$4 sm:$0xff]   ;;  %v2119_v30 = vld [vmem:[#allocation8 + $0x30] ss:$12 sps:$4 sm:$0xff]   ;;  %v2152_v31 = vld [vmem:[#allocation8 + $0x1c8] ss:$12 sps:$4 sm:$0xff]  }
  0x41   :  { %v2124_v32 = vld [vmem:[#allocation8 + $0x1c] ss:$12 sps:$4 sm:$0xff]   ;;  %v2160_v33 = vld [vmem:[#allocation8 + $0x1b4] ss:$12 sps:$4 sm:$0xff]   ;;  %v2122_v34 = vld [vmem:[#allocation8 + $0x18] ss:$12 sps:$4 sm:$0xff]  }
  0x42   :  { %v2158_v35 = vld [vmem:[#allocation8 + $0x1b0] ss:$12 sps:$4 sm:$0xff]   ;;  %v2125_v38 = vld [vmem:[#allocation8] ss:$12 sps:$4 sm:$0xff]   ;;  %v2164_v39 = vld [vmem:[#allocation8 + $0x198] ss:$12 sps:$4 sm:$0xff]  }
  0x43   :  { %v2127_v36 = vld [vmem:[#allocation8 + $0x4] ss:$12 sps:$4 sm:$0xff]   ;;  %v2166_v37 = vld [vmem:[#allocation8 + $0x19c] ss:$12 sps:$4 sm:$0xff]   ;;  %v2133_v40 = vld [vmem:[#allocation8 + $0x16c] ss:$12 sps:$4 sm:$0xff]  }
  0x44   :  { %v2131_v41 = vld [vmem:[#allocation8 + $0x168] ss:$12 sps:$4 sm:$0xff]   ;;  %v2137_v43 = vld [vmem:[#allocation8 + $0x150] ss:$12 sps:$4 sm:$0xff]   ;;  %v2143_v45 = vld [vmem:[#allocation8 + $0x138] ss:$12 sps:$4 sm:$0xff]  }
  0x45   :  { %1878 = vmatmul.mubr.msk.bf16.vlgmr.msra.gmra.mxu1 %vm157_vm0, %v84_v5  ;;  %1877 = vmatmul.mubr.msk.bf16.vlgmr.msra.gmra.mxu0 %vm157_vm0, %v84_v5  ;;  %v2139_v42 = vld [vmem:[#allocation8 + $0x154] ss:$12 sps:$4 sm:$0xff]   ;;  %v2145_v44 = vld [vmem:[#allocation8 + $0x13c] ss:$12 sps:$4 sm:$0xff]   ;;  %v2151_v46 = vld [vmem:[#allocation8 + $0x124] ss:$12 sps:$4 sm:$0xff]  }
  0x46   :  { %999 = vmatpush1.bf16.msra.mxu0 %v2104_v11  ;;  %1040 = vmatpush1.bf16.msra.mxu1 %v2128_v15  ;;  %v2149_v47 = vld [vmem:[#allocation8 + $0x120] ss:$12 sps:$4 sm:$0xff]   ;;  %v2155_v49 = vld [vmem:[#allocation8 + $0x108] ss:$12 sps:$4 sm:$0xff]   ;;  %v2161_v51 = vld [vmem:[#allocation8 + $0xf0] ss:$12 sps:$4 sm:$0xff]  }
  0x47   :  { %1000 = vmatprep.subr.bf16.mxu0 %v2109_v12  ;;  %1041 = vmatprep.subr.bf16.mxu1 %v2136_v19  ;;  %v2157_v48 = vld [vmem:[#allocation8 + $0x10c] ss:$12 sps:$4 sm:$0xff]   ;;  %v2163_v50 = vld [vmem:[#allocation8 + $0xf4] ss:$12 sps:$4 sm:$0xff]   ;;  %v2169_v52 = vld [vmem:[#allocation8 + $0xdc] ss:$12 sps:$4 sm:$0xff]  }
  0x48   :  { %v2172_v53 = vld [vmem:[#allocation8 + $0x184] ss:$12 sps:$4 sm:$0xff]   ;;  %v2170_v55 = vld [vmem:[#allocation8 + $0x180] ss:$12 sps:$4 sm:$0xff]   ;;  %v2516_v62 = vshrl.u32 %v97_v61, 7  ;;  %vm1772_vm1 = vcmask 359424  }
  0x49   :  { %v2167_v54 = vld [vmem:[#allocation8 + $0xd8] ss:$12 sps:$4 sm:$0xff]   ;;  %v2173_v58 = vld [vmem:[#allocation8 + $0xc0] ss:$12 sps:$4 sm:$0xff]   ;;  %v2179_v60 = vld [vmem:[#allocation8 + $0x170] ss:$12 sps:$4 sm:$0xff]  }
  0x4a   :  { %1001 = vmatpush1.bf16.msra.mxu0 %v2107_v13  ;;  %1042 = vmatpush1.bf16.msra.mxu1 %v2134_v18  ;;  %v2175_v56 = vld [vmem:[#allocation8 + $0xc4] ss:$12 sps:$4 sm:$0xff]   ;;  %v2176_v59 = vld [vmem:[#allocation8 + $0x240] ss:$12 sps:$4 sm:$0xff]   ;;  %v2519_v63 = vsub.s32 0, %v2516_v62  ;;  %v2522_v1 = vsub.s32 2, %v2516_v62 }
  0x4b   :  { %1002 = vmatprep.subr.bf16.mxu0 %v2112_v14  ;;  %1043 = vmatprep.subr.bf16.mxu1 %v2142_v21  ;;  %v2178_v57 = vld [vmem:[#allocation8 + $0x244] ss:$12 sps:$4 sm:$0xff]   ;;  %v93_v2 = vld [vmem:[#allocation7] sm:$0xf]  ;;  %v2525_v3 = vsub.s32 1, %v2516_v62  ;;  %v111_v4 = vsub.s32 3, %v2516_v62 }
  0x4c   :  { %v100_v5 = vrot.slane %v93_v2, %v2519_v63  ;;  %v108_v6 = vrot.slane %v93_v2, %v2522_v1  ;;  %vm1817_vm2 = vcmask 1041409   ;;  %vm1820_vm3 = vcmask 58368   ;;  %s2446_s14 = smov [#allocation11]  }
  0x4d   :  { %v104_v7 = vrot.slane %v93_v2, %v2525_v3  ;;  %v112_v8 = vrot.slane %v93_v2, %v111_v4  ;;  %s1852_s15 = sshll.u32 %s2446_s14, 4  ;;  %s1853_s15 = int_to_ptr.vmem [resolvable:$true] %s1852_s15 }
  0x4e   :  { %1003 = vmatpush1.bf16.msra.mxu0 %v2110_v17  ;;  %1044 = vmatpush1.bf16.msra.mxu1 %v2140_v23 }
  0x4f   :  { %1004 = vmatprep.subr.bf16.mxu0 %v2115_v20  ;;  %1045 = vmatprep.subr.bf16.mxu1 %v2148_v25 }
  0x52   :  { %1005 = vmatpush1.bf16.msra.mxu0 %v2113_v22  ;;  %1046 = vmatpush1.bf16.msra.mxu1 %v2146_v27 }
  0x53   :  { %1006 = vmatprep.subr.bf16.mxu0 %v2118_v24  ;;  %1047 = vmatprep.subr.bf16.mxu1 %v2154_v29  ;;  %v2181_v29 = vld [vmem:[#allocation8 + $0x230] ss:$12 sps:$4 sm:$0xff]  }
  0x56   :  { %1007 = vmatpush1.bf16.msra.mxu0 %v2116_v26  ;;  %1048 = vmatpush1.bf16.msra.mxu1 %v2152_v31  ;;  %v2182_v31 = vld [vmem:[#allocation8 + $0x158] ss:$12 sps:$4 sm:$0xff]  }
  0x57   :  { %1008 = vmatprep.subr.bf16.mxu0 %v2121_v28  ;;  %1049 = vmatprep.subr.bf16.mxu1 %v2160_v33  ;;  %v2180_v28 = vld [vmem:[#allocation8 + $0xb0] ss:$12 sps:$4 sm:$0xff]  }
  0x5a   :  { %1009 = vmatpush1.bf16.msra.mxu0 %v2119_v30  ;;  %1050 = vmatpush1.bf16.msra.mxu1 %v2158_v35 }
  0x5b   :  { %1010 = vmatprep.subr.bf16.mxu0 %v2124_v32  ;;  %1051 = vmatprep.subr.bf16.mxu1 %v2166_v37  ;;  %v2184_v37 = vld [vmem:[#allocation8 + $0x218] ss:$12 sps:$4 sm:$0xff]  }
  0x5e   :  { %1011 = vmatpush1.bf16.msra.mxu0 %v2122_v34  ;;  %1052 = vmatpush1.bf16.msra.mxu1 %v2164_v39 }
  0x5f   :  { %1012 = vmatprep.subr.bf16.mxu0 %v2127_v36  ;;  %1053 = vmatprep.subr.bf16.mxu1 %v2172_v53  ;;  %v2183_v36 = vld [vmem:[#allocation8 + $0x98] ss:$12 sps:$4 sm:$0xff]  }
  0x60   :  { %v2196_v53 = vld [vmem:[#allocation8 + $0x1b8] ss:$12 sps:$4 sm:$0xff]  }
  0x62   :  { %1013 = vmatpush1.bf16.msra.mxu0 %v2125_v38  ;;  %1054 = vmatpush1.bf16.msra.mxu1 %v2170_v55  ;;  %v2185_v38 = vld [vmem:[#allocation8 + $0x140] ss:$12 sps:$4 sm:$0xff]   ;;  %v2550_v55 = vld [vmem:[#allocation7 + $0x4] sm:$0xf] }
  0x63   :  { %1014 = vmatprep.subr.bf16.mxu0 %v2133_v40  ;;  %1069 = vmatprep.subr.bf16.mxu1 %v2178_v57  ;;  %v2198_v57 = vld [vmem:[#allocation8 + $0x20] ss:$12 sps:$4 sm:$0xff]  }
  0x66   :  { %1015 = vmatpush2.bf16.msra.mxu0 %v2131_v41  ;;  %1070 = vmatpush2.bf16.msra.mxu1 %v2176_v59  ;;  %v2200_v59 = vld [vmem:[#allocation8 + $0xc8] ss:$12 sps:$4 sm:$0xff]  }
  0x67   :  { %1016 = vmatprep.subr.bf16.mxu0 %v2139_v42  ;;  %2033 = vmatprep.subr.bf16.mxu1 %v2179_v60  ;;  %v128_v60 = vrot.slane %v2550_v55, %v111_v4  ;;  %v2212_v4 = vld [vmem:[#allocation8 + $0x484] ss:$12 sps:$4 sm:$0xff]  }
  0x6a   :  { %1017 = vmatpush2.bf16.msra.mxu0 %v2137_v43  ;;  %v2186_v43 = vld [vmem:[#allocation8 + $0x80] ss:$12 sps:$4 sm:$0xff]  }
  0x6b   :  { %1018 = vmatprep.subr.bf16.mxu0 %v2145_v44  ;;  %v2187_v44 = vld [vmem:[#allocation8 + $0x200] ss:$12 sps:$4 sm:$0xff]  }
  0x6e   :  { %1019 = vmatpush2.bf16.msra.mxu0 %v2143_v45  ;;  %v2188_v45 = vld [vmem:[#allocation8 + $0x128] ss:$12 sps:$4 sm:$0xff]  }
  0x6f   :  { %1020 = vmatprep.subr.bf16.mxu0 %v2151_v46  ;;  %v2189_v46 = vld [vmem:[#allocation8 + $0x68] ss:$12 sps:$4 sm:$0xff]  }
  0x72   :  { %1021 = vmatpush2.bf16.msra.mxu0 %v2149_v47  ;;  %v2190_v47 = vld [vmem:[#allocation8 + $0x1e8] ss:$12 sps:$4 sm:$0xff]  }
  0x73   :  { %1022 = vmatprep.subr.bf16.mxu0 %v2157_v48  ;;  %v2191_v48 = vld [vmem:[#allocation8 + $0x110] ss:$12 sps:$4 sm:$0xff]  }
  0x76   :  { %1023 = vmatpush2.bf16.msra.mxu0 %v2155_v49  ;;  %v2192_v49 = vld [vmem:[#allocation8 + $0x50] ss:$12 sps:$4 sm:$0xff]  }
  0x77   :  { %1024 = vmatprep.subr.bf16.mxu0 %v2163_v50  ;;  %v2193_v50 = vld [vmem:[#allocation8 + $0x1d0] ss:$12 sps:$4 sm:$0xff]  }
  0x7a   :  { %1025 = vmatpush2.bf16.msra.mxu0 %v2161_v51  ;;  %v2194_v51 = vld [vmem:[#allocation8 + $0xf8] ss:$12 sps:$4 sm:$0xff]  }
  0x7b   :  { %1026 = vmatprep.subr.bf16.mxu0 %v2169_v52  ;;  %v2195_v52 = vld [vmem:[#allocation8 + $0x38] ss:$12 sps:$4 sm:$0xff]  }
  0x7e   :  { %1027 = vmatpush2.bf16.msra.mxu0 %v2167_v54  ;;  %v2197_v54 = vld [vmem:[#allocation8 + $0xe0] ss:$12 sps:$4 sm:$0xff]  }
  0x7f   :  { %1028 = vmatprep.subr.bf16.mxu0 %v2175_v56  ;;  %v120_v56 = vrot.slane %v2550_v55, %v2525_v3 }
  0x82   :  { %1029 = vmatpush2.bf16.msra.mxu0 %v2173_v58  ;;  %v2199_v58 = vld [vmem:[#allocation8 + $0x1a0] ss:$12 sps:$4 sm:$0xff]  }
  0x83   :  { %1120 = vmatprep.subr.bf16.mxu0 %v2444_v0 }
  0xfd   :  { %v195_v9 = vpop.f32.mrf.mxu0  ;;  %v236_v10 = vpop.f32.mrf.mxu1 }
  0xfe   :  { %v196_v11 = vadd.f32 %v195_v9, %v100_v5  ;;  %v237_v12 = vadd.f32 %v236_v10, %v108_v6  ;;  %v2201_v5 = vld [vmem:[#allocation8 + $0x8] ss:$12 sps:$4 sm:$0xff]   ;;  %v2203_v10 = vld [vmem:[#allocation8 + $0x300] ss:$12 sps:$4 sm:$0xff]  }
  0xff   :  { %v197_v13 = vpop.f32.mrf.mxu0  ;;  %v238_v14 = vpop.f32.mrf.mxu1  ;;  %v2202_v6 = vld [vmem:[#allocation8 + $0x188] ss:$12 sps:$4 sm:$0xff]  }
 0x100   :  { %v345_v15 = vmax.f32 %v196_v11, 0.0  ;;  %v198_v16 = vadd.f32 %v197_v13, %v104_v7  ;;  %v239_v17 = vadd.f32 %v238_v14, %v112_v8  ;;  %v347_v18 = vmax.f32 %v237_v12, 0.0  ;;  %v2205_v7 = vld [vmem:[#allocation8 + $0x304] ss:$12 sps:$4 sm:$0xff]   ;;  %v2206_v11 = vld [vmem:[#allocation8 + $0x248] ss:$12 sps:$4 sm:$0xff]  }
 0x101   :  { %v240_v19 = vpop.f32.mrf.mxu1  ;;  %v199_v20 = vpop.f32.mrf.mxu0  ;;  %v2209_v12 = vld [vmem:[#allocation8 + $0x2ec] ss:$12 sps:$4 sm:$0xff]  }
 0x102   :  { %v346_v21 = vmax.f32 %v198_v16, 0.0  ;;  %v348_v22 = vmax.f32 %v239_v17, 0.0  ;;  %v2533_v23 = vpack.c.bf16 %v345_v15, %v345_v15  ;;  %v2535_v30 = vpack.c.bf16 %v347_v18, %v347_v18  ;;  %v2207_v15 = vld [vmem:[#allocation8 + $0x2e8] ss:$12 sps:$4 sm:$0xff]   ;;  %v2210_v16 = vld [vmem:[#allocation8 + $0x480] ss:$12 sps:$4 sm:$0xff]  }
 0x103   :  { %v241_v24 = vpop.f32.mrf.mxu1  ;;  %v200_v25 = vpop.f32.mrf.mxu0  ;;  %v2215_v17 = vld [vmem:[#allocation8 + $0x2d4] ss:$12 sps:$4 sm:$0xff]   ;;  %v2218_v18 = vld [vmem:[#allocation8 + $0x46c] ss:$12 sps:$4 sm:$0xff]   ;;  %v2213_v20 = vld [vmem:[#allocation8 + $0x2d0] ss:$12 sps:$4 sm:$0xff]  }
 0x104   :  { %v354_v26 = vpack.c.bf16 %v346_v21, %v346_v21  ;;  %v356_v27 = vpack.c.bf16 %v348_v22, %v348_v22  ;;  %v2216_v21 = vld [vmem:[#allocation8 + $0x468] ss:$12 sps:$4 sm:$0xff]   ;;  %v2219_v24 = vld [vmem:[#allocation8 + $0x2b8] ss:$12 sps:$4 sm:$0xff]   ;;  %v2222_v25 = vld [vmem:[#allocation8 + $0x450] ss:$12 sps:$4 sm:$0xff]  }
 0x105   :  { %v2537_v32 = vpop.f32.mrf.mxu1  ;;  %v2539_v33 = vpop.f32.mrf.mxu0  ;;  %v2221_v22 = vld [vmem:[#allocation8 + $0x2bc] ss:$12 sps:$4 sm:$0xff]  }
 0x106   :  { %1030 = vmatprep.mubr.bf16.mxu0 %v354_v26  ;;  %1954 = vmatprep.mubr.msk.bf16.mxu1 %vm157_vm0, %v356_v27 }
 0x107   :  { %1031 = vmatmul.mubr.bf16.vlgmr.msra.gmra.mxu0 %v2533_v23  ;;  %1072 = vmatmul.mubr.bf16.vlgmr.msra.gmra.mxu1 %v2535_v30  ;;  %v340_v34 = vpop.f32.mrf.mxu1  ;;  %v299_v35 = vpop.f32.mrf.mxu0 }
 0x108   :  { %2034 = vmatpush3.bf16.msra.mxu1 %v2180_v28  ;;  %1121 = vmatpush1.bf16.msra.mxu0 %v2181_v29  ;;  %v300_v2 = vadd.f32 %v299_v35, %v120_v56  ;;  %v341_v8 = vadd.f32 %v340_v34, %v128_v60  ;;  %v2225_v28 = vld [vmem:[#allocation8 + $0x2a0] ss:$12 sps:$4 sm:$0xff]   ;;  %v2228_v29 = vld [vmem:[#allocation8 + $0x438] ss:$12 sps:$4 sm:$0xff]   ;;  %v2231_v34 = vld [vmem:[#allocation8 + $0x288] ss:$12 sps:$4 sm:$0xff]  }
 0x109   :  { %1955 = vmatprep.mubr.msk.bf16.mxu0 %vm157_vm0, %v356_v27  ;;  %2035 = vmatprep.subr.bf16.mxu1 %v2182_v31  ;;  %v301_v39 = vpop.f32.mrf.mxu0  ;;  %v342_v40 = vpop.f32.mrf.mxu1  ;;  %v2230_v27 = vld [vmem:[#allocation8 + $0x43c] ss:$12 sps:$4 sm:$0xff]   ;;  %v2236_v31 = vld [vmem:[#allocation8 + $0x424] ss:$12 sps:$4 sm:$0xff]   ;;  %v2234_v35 = vld [vmem:[#allocation8 + $0x420] ss:$12 sps:$4 sm:$0xff]  }
 0x10a   :  { %1122 = vmatprep.subr.bf16.mxu0 %v2444_v0  ;;  %1112 = vmatprep.mubr.bf16.mxu1 %v354_v26  ;;  %v350_v9 = vmax.f32 %v300_v2, 0.0  ;;  %v352_v13 = vmax.f32 %v341_v8, 0.0  ;;  %v2227_v26 = vld [vmem:[#allocation8 + $0x2a4] ss:$12 sps:$4 sm:$0xff]   ;;  %v2240_v39 = vld [vmem:[#allocation8 + $0x408] ss:$12 sps:$4 sm:$0xff]  }
 0x10b   :  { %v302_v41 = vpop.f32.mrf.mxu0  ;;  %v343_v42 = vpop.f32.mrf.mxu1  ;;  %v2245_v40 = vld [vmem:[#allocation8 + $0x25c] ss:$12 sps:$4 sm:$0xff]   ;;  %v2263_v56 = vld [vmem:[#allocation8 + $0x394] ss:$12 sps:$4 sm:$0xff]   ;;  %v2265_v60 = vld [vmem:[#allocation8 + $0x378] ss:$12 sps:$4 sm:$0xff]  }
 0x10c   :  { %2036 = vmatpush3.bf16.msra.mxu1 %v2183_v36  ;;  %1123 = vmatpush1.bf16.msra.mxu0 %v2184_v37  ;;  %v2560_v14 = vpack.c.bf16 %v350_v9, %v350_v9  ;;  %v2563_v19 = vpack.c.bf16 %v352_v13, %v352_v13  ;;  %v2239_v36 = vld [vmem:[#allocation8 + $0x274] ss:$12 sps:$4 sm:$0xff]   ;;  %v2242_v37 = vld [vmem:[#allocation8 + $0x40c] ss:$12 sps:$4 sm:$0xff]   ;;  %v124_v42 = vrot.slane %v2550_v55, %v2522_v1  ;;  %v2268_v2 = vld [vmem:[#allocation8 + $0x470] ss:$12 sps:$4 sm:$0xff]  }
 0x10d   :  { %2037 = vmatprep.subr.bf16.mxu1 %v2185_v38  ;;  %1124 = vmatprep.subr.bf16.mxu0 %v2444_v0  ;;  %v2237_v38 = vld [vmem:[#allocation8 + $0x270] ss:$12 sps:$4 sm:$0xff]   ;;  %v2248_v41 = vld [vmem:[#allocation8 + $0x3f4] ss:$12 sps:$4 sm:$0xff]   ;;  %v2275_v8 = vld [vmem:[#allocation8 + $0x34c] ss:$12 sps:$4 sm:$0xff]  }
 0x10e   :  { %v2273_v9 = vld [vmem:[#allocation8 + $0x348] ss:$12 sps:$4 sm:$0xff]  }
 0x10f   :  { %v2280_v13 = vld [vmem:[#allocation8 + $0x428] ss:$12 sps:$4 sm:$0xff]  }
 0x110   :  { %2038 = vmatpush3.bf16.msra.mxu1 %v2186_v43  ;;  %1125 = vmatpush1.bf16.msra.mxu0 %v2187_v44  ;;  %v2243_v43 = vld [vmem:[#allocation8 + $0x258] ss:$12 sps:$4 sm:$0xff]   ;;  %v2246_v44 = vld [vmem:[#allocation8 + $0x3f0] ss:$12 sps:$4 sm:$0xff]  }
 0x111   :  { %2039 = vmatprep.subr.bf16.mxu1 %v2188_v45  ;;  %1126 = vmatprep.subr.bf16.mxu0 %v2444_v0  ;;  %v2251_v45 = vld [vmem:[#allocation8 + $0x3c4] ss:$12 sps:$4 sm:$0xff]  }
 0x114   :  { %2040 = vmatpush3.bf16.msra.mxu1 %v2189_v46  ;;  %1127 = vmatpush1.bf16.msra.mxu0 %v2190_v47  ;;  %v2254_v46 = vld [vmem:[#allocation8 + $0x3dc] ss:$12 sps:$4 sm:$0xff]   ;;  %v339_v47 = vadd.f32 %v2537_v32, %v124_v42 }
 0x115   :  { %2041 = vmatprep.subr.bf16.mxu1 %v2191_v48  ;;  %1128 = vmatprep.subr.bf16.mxu0 %v2444_v0  ;;  %v2249_v48 = vld [vmem:[#allocation8 + $0x3c0] ss:$12 sps:$4 sm:$0xff]   ;;  %v2261_v32 = vld [vmem:[#allocation8 + $0x390] ss:$12 sps:$4 sm:$0xff]  }
 0x118   :  { %2042 = vmatpush3.bf16.msra.mxu1 %v2192_v49  ;;  %1129 = vmatpush1.bf16.msra.mxu0 %v2193_v50  ;;  %v2252_v49 = vld [vmem:[#allocation8 + $0x3d8] ss:$12 sps:$4 sm:$0xff]  }
 0x119   :  { %2043 = vmatprep.subr.bf16.mxu1 %v2194_v51  ;;  %1130 = vmatprep.subr.bf16.mxu0 %v2444_v0  ;;  %v2257_v50 = vld [vmem:[#allocation8 + $0x3ac] ss:$12 sps:$4 sm:$0xff]   ;;  %v2260_v51 = vld [vmem:[#allocation8 + $0x49c] ss:$12 sps:$4 sm:$0xff]  }
 0x11c   :  { %2044 = vmatpush3.bf16.msra.mxu1 %v2195_v52  ;;  %1131 = vmatpush1.bf16.msra.mxu0 %v2196_v53  ;;  %v351_v52 = vmax.f32 %v339_v47, 0.0  ;;  %v2255_v53 = vld [vmem:[#allocation8 + $0x3a8] ss:$12 sps:$4 sm:$0xff]  }
 0x11d   :  { %2045 = vmatprep.subr.bf16.mxu1 %v2197_v54  ;;  %1132 = vmatprep.subr.bf16.mxu0 %v2444_v0  ;;  %v2258_v54 = vld [vmem:[#allocation8 + $0x498] ss:$12 sps:$4 sm:$0xff]   ;;  %v561_v47 = vld [vmem:[%s2634_s4] sm:$0x7] }
 0x120   :  { %2046 = vmatpush3.bf16.msra.mxu1 %v2198_v57  ;;  %1133 = vmatpush1.bf16.msra.mxu0 %v2199_v58  ;;  %v2572_v57 = vpack.c.bf16 %v351_v52, %v351_v52  ;;  %v2264_v58 = vld [vmem:[#allocation8 + $0x488] ss:$12 sps:$4 sm:$0xff]  }
 0x121   :  { %2047 = vmatprep.subr.bf16.mxu1 %v2200_v59  ;;  %1134 = vmatprep.subr.bf16.mxu0 %v2444_v0  ;;  %v2267_v59 = vld [vmem:[#allocation8 + $0x37c] ss:$12 sps:$4 sm:$0xff]  }
 0x124   :  { %2048 = vmatpush3.bf16.msra.mxu1 %v2201_v5  ;;  %1135 = vmatpush1.bf16.msra.mxu0 %v2202_v6  ;;  %v2271_v5 = vld [vmem:[#allocation8 + $0x364] ss:$12 sps:$4 sm:$0xff]   ;;  %v2269_v6 = vld [vmem:[#allocation8 + $0x360] ss:$12 sps:$4 sm:$0xff]  }
 0x125   :  { %1150 = vmatprep.subr.bf16.mxu0 %v2444_v0  ;;  %1563 = vmatprep.subr.bf16.mxu1 %v2205_v7  ;;  %v2272_v7 = vld [vmem:[#allocation8 + $0x458] ss:$12 sps:$4 sm:$0xff]  }
 0x127   :  { %1113 = vmatmul.mubr.bf16.vlgmr.msra.gmra.mxu1 %v2533_v23  ;;  %v2224_v23 = vld [vmem:[#allocation8 + $0x454] ss:$12 sps:$4 sm:$0xff]  }
 0x128   :  { %1151 = vmatpush2.bf16.msra.mxu0 %v2206_v11  ;;  %1564 = vmatpush1.bf16.msra.mxu1 %v2203_v10  ;;  %v2276_v10 = vld [vmem:[#allocation8 + $0x440] ss:$12 sps:$4 sm:$0xff]   ;;  %v116_v11 = vrot.slane %v2550_v55, %v2519_v63  ;;  %v2285_v55 = vld [vmem:[#allocation8 + $0x3c8] ss:$12 sps:$4 sm:$0xff]  }
 0x129   :  { %1565 = vmatprep.subr.bf16.mxu1 %v2209_v12  ;;  %1604 = vmatprep.subr.bf16.mxu0 %v2212_v4  ;;  %v2279_v12 = vld [vmem:[#allocation8 + $0x334] ss:$12 sps:$4 sm:$0xff]   ;;  %v2277_v4 = vld [vmem:[#allocation8 + $0x330] ss:$12 sps:$4 sm:$0xff]  }
 0x12a   :  { %1595 = vmatprep.mubr.bf16.mxu1 %v2560_v14 }
 0x12b   :  { %1153 = vmatmul.mubr.bf16.vlgmr.msra.gmra.mxu0 %v2535_v30  ;;  %v2233_v30 = vld [vmem:[#allocation8 + $0x28c] ss:$12 sps:$4 sm:$0xff]  }
 0x12c   :  { %1566 = vmatpush1.bf16.msra.mxu1 %v2207_v15  ;;  %1605 = vmatpush1.bf16.msra.mxu0 %v2210_v16  ;;  %v298_v15 = vadd.f32 %v2539_v33, %v116_v11  ;;  %v2283_v16 = vld [vmem:[#allocation8 + $0x31c] ss:$12 sps:$4 sm:$0xff]   ;;  %v2287_v33 = vld [vmem:[#allocation8 + $0x3f8] ss:$12 sps:$4 sm:$0xff]  }
 0x12d   :  { %1567 = vmatprep.subr.bf16.mxu1 %v2215_v17  ;;  %1606 = vmatprep.subr.bf16.mxu0 %v2218_v18  ;;  %v2281_v17 = vld [vmem:[#allocation8 + $0x318] ss:$12 sps:$4 sm:$0xff]   ;;  %v2284_v18 = vld [vmem:[#allocation8 + $0x410] ss:$12 sps:$4 sm:$0xff]  }
 0x12e   :  { %2031 = vmatprep.mubr.msk.bf16.mxu0 %vm157_vm0, %v2563_v19 }
 0x130   :  { %1568 = vmatpush1.bf16.msra.mxu1 %v2213_v20  ;;  %1607 = vmatpush1.bf16.msra.mxu0 %v2216_v21  ;;  %v2286_v20 = vld [vmem:[#allocation8 + $0x308] ss:$12 sps:$4 sm:$0xff]  }
 0x131   :  { %1569 = vmatprep.subr.bf16.mxu1 %v2221_v22  ;;  %1608 = vmatprep.subr.bf16.mxu0 %v2224_v23  ;;  %v2288_v22 = vld [vmem:[#allocation8 + $0x3b0] ss:$12 sps:$4 sm:$0xff]  }
 0x132   :  { %v2289_v23 = vld [vmem:[#allocation8 + $0x2f0] ss:$12 sps:$4 sm:$0xff]  }
 0x134   :  { %1570 = vmatpush1.bf16.msra.mxu1 %v2219_v24  ;;  %1609 = vmatpush1.bf16.msra.mxu0 %v2222_v25  ;;  %v2290_v24 = vld [vmem:[#allocation8 + $0x3e0] ss:$12 sps:$4 sm:$0xff]   ;;  %v2291_v25 = vld [vmem:[#allocation8 + $0x398] ss:$12 sps:$4 sm:$0xff]  }
 0x135   :  { %1571 = vmatprep.subr.bf16.mxu1 %v2227_v26  ;;  %1610 = vmatprep.subr.bf16.mxu0 %v2230_v27  ;;  %v2292_v26 = vld [vmem:[#allocation8 + $0x2d8] ss:$12 sps:$4 sm:$0xff]   ;;  %v2293_v27 = vld [vmem:[#allocation8 + $0x4a0] ss:$12 sps:$4 sm:$0xff]  }
 0x138   :  { %1572 = vmatpush1.bf16.msra.mxu1 %v2225_v28  ;;  %1611 = vmatpush1.bf16.msra.mxu0 %v2228_v29  ;;  %v2294_v28 = vld [vmem:[#allocation8 + $0x380] ss:$12 sps:$4 sm:$0xff]  }
 0x139   :  { %1573 = vmatprep.subr.bf16.mxu1 %v2233_v30  ;;  %1612 = vmatprep.subr.bf16.mxu0 %v2236_v31  ;;  %v2295_v29 = vld [vmem:[#allocation8 + $0x2c0] ss:$12 sps:$4 sm:$0xff]   ;;  %v2297_v30 = vld [vmem:[#allocation8 + $0x2a8] ss:$12 sps:$4 sm:$0xff]   ;;  %v2298_v31 = vld [vmem:[#allocation8 + $0x350] ss:$12 sps:$4 sm:$0xff]  }
 0x13c   :  { %1574 = vmatpush1.bf16.msra.mxu1 %v2231_v34  ;;  %1613 = vmatpush1.bf16.msra.mxu0 %v2234_v35  ;;  %v1782_v34 = vld [vmem:[%s2636_s6] sm:$0x3]  ;;  %v2299_v35 = vld [vmem:[#allocation8 + $0x290] ss:$12 sps:$4 sm:$0xff]  }
 0x13d   :  { %1575 = vmatprep.subr.bf16.mxu1 %v2239_v36  ;;  %1614 = vmatprep.subr.bf16.mxu0 %v2242_v37  ;;  %v2301_v36 = vld [vmem:[#allocation8 + $0x278] ss:$12 sps:$4 sm:$0xff]   ;;  %v2302_v37 = vld [vmem:[#allocation8 + $0x320] ss:$12 sps:$4 sm:$0xff]  }
 0x13e   :  { %1785 = vperm.xlu1 %2090, %v1782_v34  }
 0x140   :  { %1576 = vmatpush1.bf16.msra.mxu1 %v2237_v38  ;;  %1615 = vmatpush1.bf16.msra.mxu0 %v2240_v39  ;;  %v2303_v38 = vld [vmem:[#allocation8 + $0x260] ss:$12 sps:$4 sm:$0xff]  }
 0x141   :  { %1577 = vmatprep.subr.bf16.mxu1 %v2245_v40  ;;  %1616 = vmatprep.subr.bf16.mxu0 %v2248_v41 }
 0x144   :  { %1578 = vmatpush1.bf16.msra.mxu1 %v2243_v43  ;;  %1617 = vmatpush1.bf16.msra.mxu0 %v2246_v44 }
 0x145   :  { %1579 = vmatprep.subr.bf16.mxu1 %v2251_v45  ;;  %1618 = vmatprep.subr.bf16.mxu0 %v2254_v46 }
 0x148   :  { %1580 = vmatpush2.bf16.msra.mxu1 %v2249_v48  ;;  %1619 = vmatpush1.bf16.msra.mxu0 %v2252_v49  ;;  %v572_v48 = vrot.slane %v561_v47, %v2525_v3  ;;  %v568_v49 = vrot.slane %v561_v47, %v2519_v63 }
 0x149   :  { %1581 = vmatprep.subr.bf16.mxu1 %v2257_v50  ;;  %1634 = vmatprep.subr.bf16.mxu0 %v2260_v51 }
 0x14c   :  { %1582 = vmatpush2.bf16.msra.mxu1 %v2255_v53  ;;  %1635 = vmatpush2.bf16.msra.mxu0 %v2258_v54  ;;  %v576_v54 = vrot.slane %v561_v47, %v2522_v1 }
 0x14d   :  { %1583 = vmatprep.subr.bf16.mxu1 %v2263_v56  ;;  %1685 = vmatprep.subr.bf16.mxu0 %v2444_v0 }
 0x14f   :  { %1637 = vmatmul.mubr.bf16.vlgmr.msra.gmra.mxu0 %v2572_v57 }
 0x150   :  { %1584 = vmatpush2.bf16.msra.mxu1 %v2261_v32  ;;  %1686 = vmatpush1.bf16.msra.mxu0 %v2264_v58  ;;  %v1731_v32 = vld [vmem:[%s2635_s5] sm:$0x7] }
 0x151   :  { %1585 = vmatprep.subr.bf16.mxu1 %v2267_v59  ;;  %1687 = vmatprep.subr.bf16.mxu0 %v2444_v0 }
 0x152   :  { %2032 = vmatprep.mubr.msk.bf16.mxu0 %vm157_vm0, %v2563_v19  ;;  %v349_v19 = vmax.f32 %v298_v15, 0.0 }
 0x154   :  { %1586 = vmatpush2.bf16.msra.mxu1 %v2265_v60  ;;  %1688 = vmatpush1.bf16.msra.mxu0 %v2268_v2  ;;  %v357_v21 = vpack.c.bf16 %v349_v19, %v349_v19  ;;  %v1742_v60 = vrot.slane %v1731_v32, %v2525_v3 }
 0x155   :  { %1587 = vmatprep.subr.bf16.mxu1 %v2271_v5  ;;  %1689 = vmatprep.subr.bf16.mxu0 %v2444_v0 }
 0x158   :  { %1588 = vmatpush2.bf16.msra.mxu1 %v2269_v6  ;;  %1690 = vmatpush1.bf16.msra.mxu0 %v2272_v7 }
 0x159   :  { %1589 = vmatprep.subr.bf16.mxu1 %v2275_v8  ;;  %1691 = vmatprep.subr.bf16.mxu0 %v2444_v0  ;;  %v1738_v8 = vrot.slane %v1731_v32, %v2519_v63 }
 0x15c   :  { %1590 = vmatpush2.bf16.msra.mxu1 %v2273_v9  ;;  %1692 = vmatpush1.bf16.msra.mxu0 %v2276_v10 }
 0x15d   :  { %1591 = vmatprep.subr.bf16.mxu1 %v2279_v12  ;;  %1693 = vmatprep.subr.bf16.mxu0 %v2444_v0  ;;  %v1746_v12 = vrot.slane %v1731_v32, %v2522_v1 }
 0x160   :  { %1592 = vmatpush2.bf16.msra.mxu1 %v2277_v4  ;;  %1694 = vmatpush1.bf16.msra.mxu0 %v2280_v13 }
 0x161   :  { %1593 = vmatprep.subr.bf16.mxu1 %v2283_v16  ;;  %1695 = vmatprep.subr.bf16.mxu0 %v2444_v0 }
 0x164   :  { %1594 = vmatpush2.bf16.msra.mxu1 %v2281_v17  ;;  %1696 = vmatpush1.bf16.msra.mxu0 %v2284_v18 }
 0x165   :  { %2055 = vmatprep.subr.bf16.mxu1 %v2285_v55  ;;  %1697 = vmatprep.subr.bf16.mxu0 %v2444_v0 }
 0x167   :  { %1596 = vmatmul.mubr.bf16.vlgmr.msra.gmra.mxu1 %v357_v21 }
 0x168   :  { %2056 = vmatpush3.bf16.msra.mxu1 %v2286_v20  ;;  %1677 = vmatprep.mubr.bf16.mxu1 %v2560_v14  ;;  %v2296_v14 = vld [vmem:[#allocation8 + $0x368] ss:$12 sps:$4 sm:$0xff]  }
 0x169   :  { %1698 = vmatpush1.bf16.msra.mxu0 %v2287_v33  ;;  %2057 = vmatprep.subr.bf16.mxu1 %v2288_v22 }
 0x16a   :  { %1699 = vmatprep.subr.bf16.mxu0 %v2444_v0 }
 0x16c   :  { %2058 = vmatpush3.bf16.msra.mxu1 %v2289_v23 }
 0x16d   :  { %1700 = vmatpush1.bf16.msra.mxu0 %v2290_v24  ;;  %2059 = vmatprep.subr.bf16.mxu1 %v2291_v25 }
 0x16e   :  { %1715 = vmatprep.subr.bf16.mxu0 %v2444_v0  ;;  %v2300_v0 = vld [vmem:[#allocation8 + $0x338] ss:$12 sps:$4 sm:$0xff]  }
 0x170   :  { %2060 = vmatpush3.bf16.msra.mxu1 %v2292_v26 }
 0x171   :  { %1716 = vmatpush2.bf16.msra.mxu0 %v2293_v27  ;;  %2061 = vmatprep.subr.bf16.mxu1 %v2294_v28 }
 0x174   :  { %1718 = vmatmul.mubr.bf16.vlgmr.msra.gmra.mxu0 %v2572_v57  ;;  %2062 = vmatpush3.bf16.msra.mxu1 %v2295_v29 }
 0x175   :  { %2063 = vmatprep.subr.bf16.mxu1 %v2296_v14 }
 0x178   :  { %2064 = vmatpush3.bf16.msra.mxu1 %v2297_v30 }
 0x179   :  { %2065 = vmatprep.subr.bf16.mxu1 %v2298_v31  ;;  %v562_v31 = vld [vmem:[%s2634_s4 + $0x3] sm:$0x7]  ;;  %s2445_s4 = smov [#allocation10]  }
 0x17a   :  { %v584_v34 = vrot.slane %v562_v31, %v2525_v3 }
 0x17c   :  { %2066 = vmatpush3.bf16.msra.mxu1 %v2299_v35  ;;  %v580_v35 = vrot.slane %v562_v31, %v2519_v63 }
 0x17d   :  { %2067 = vmatprep.subr.bf16.mxu1 %v2300_v0 }
 0x180   :  { %2068 = vmatpush3.bf16.msra.mxu1 %v2301_v36 }
 0x181   :  { %2069 = vmatprep.subr.bf16.mxu1 %v2302_v37 }
 0x184   :  { %2070 = vmatpush3.bf16.msra.mxu1 %v2303_v38 }
 0x187   :  { %1678 = vmatmul.mubr.bf16.vlgmr.msra.gmra.mxu1 %v357_v21 }
 0x1c7   :  { %v1032_v39 = vpop.f32.mrf.mxu0  ;;  %v1073_v40 = vpop.f32.mrf.mxu1 }
 0x1c8   :  { %v1033_v51 = vadd.f32 %v1032_v39, %v568_v49  ;;  %v588_v39 = vrot.slane %v562_v31, %v2522_v1 }
 0x1c9   :  { %v1034_v41 = vpop.f32.mrf.mxu0  ;;  %v1075_v42 = vpop.f32.mrf.mxu1 }
 0x1ca   :  { %v1035_v50 = vadd.f32 %v1034_v41, %v572_v48  ;;  %v1074_v56 = vadd.f32 %v1073_v40, %v1033_v51 }
 0x1cb   :  { %v1077_v43 = vpop.f32.mrf.mxu1  ;;  %v1036_v44 = vpop.f32.mrf.mxu0 }
 0x1cc   :  { %v1076_v52 = vadd.f32 %v1075_v42, %v1035_v50  ;;  %v1725_v7 = vmax.f32 %v1074_v56, 0.0  ;;  %v1732_v42 = vld [vmem:[%s2635_s5 + $0x3] sm:$0x7]  ;;  %s1842_s5 = sshll.u32 %s2445_s4, 4  ;;  %s1843_s5 = int_to_ptr.vmem [resolvable:$true] %s1842_s5 }
 0x1cd   :  { %v1078_v45 = vpop.f32.mrf.mxu1  ;;  %v1037_v46 = vpop.f32.mrf.mxu0  ;;  %v1750_v49 = vrot.slane %v1732_v42, %v2519_v63  ;;  %s2384_s16 = scalar_lea.vmem %s1843_s5, 32  ;;  %p2389_p7 = scmp.lt.s32.totalorder %s1843_s5, %s1843_s5 }
 0x1ce   :  { %v1726_v59 = vmax.f32 %v1076_v52, 0.0  ;;  %v1765_v16 = vmul.f32 %v1738_v8, %v1725_v7  ;;  %v1754_v45 = vrot.slane %v1732_v42, %v2525_v3  ;;  %v1758_v52 = vrot.slane %v1732_v42, %v2522_v1  ;;  %p2385_p6 = scmp.ne.s32.totalorder %s1843_s5, %s2384_s16  ;;  %p2390_p8 = scmp.lt.s32.totalorder %s2384_s16, %s2384_s16 }
 0x1d0   :  { %v1766_v4 = vmul.f32 %v1742_v60, %v1726_v59  ;;  %v1786_v60 = vpop.permute.xlu1 %1785  ;;  %p2391_p9 = por %p2390_p8, %p2389_p7 }
 0x1d1   :  { %v1794_v7 = vrot.slane %v1786_v60, %v2525_v3 }
 0x1d2   :  { %v1771_v19 = vadd.f32 %v1766_v4, %v1765_v16  ;;  %p2392_p10 = pnand %p2391_p9, %p2385_p6 }
 0x1e7   :  { %v2049_v53 = vpop.f32.mrf.mxu1 }
 0x1e9   :  { %v2050_v57 = vpop.f32.mrf.mxu1 }
 0x1ea   :  { %v2051_v58 = vadd.f32 %v2050_v57, %v2049_v53 }
 0x1eb   :  { %v2052_v2 = vpop.f32.mrf.mxu1  ;;  %v1154_v5 = vpop.f32.mrf.mxu0 }
 0x1ec   :  { %v1115_v6 = vadd.f32 %v2051_v58, %v576_v54  ;;  %v1790_v2 = vrot.slane %v1786_v60, %v2519_v63 }
 0x1ed   :  { %v2053_v9 = vpop.f32.mrf.mxu1  ;;  %v1156_v10 = vpop.f32.mrf.mxu0 }
 0x1ee   :  { %v1155_v11 = vadd.f32 %v1154_v5, %v1115_v6 }
 0x1ef   :  { %v1157_v13 = vpop.f32.mrf.mxu0 }
 0x1f0   :  { %v1727_v15 = vmax.f32 %v1155_v11, 0.0 }
 0x1f1   :  { %v1158_v17 = vpop.f32.mrf.mxu0 }
 0x1f2   :  { %v1767_v18 = vmul.f32 %v1746_v12, %v1727_v15  ;;  %v1808_v12 = vand.u32 127, %v97_v61 }
 0x1f4   :  { %v1773_v55 = vsel %vm1772_vm1, %v1767_v18, 0.0  ;;  %v1811_v4 = vsub.s32 %v1808_v12, %v2516_v62 }
 0x1f5   :  { %v1774_v20 = vadd.f32 %v1773_v55, %v1771_v19 }
 0x1f7   :  { %1775 = vadd.xlane.f32.xlu0 %v1774_v20 }
 0x20f   :  { %v1638_v21 = vpop.f32.mrf.mxu0 }
 0x211   :  { %v1640_v33 = vpop.f32.mrf.mxu0 }
 0x213   :  { %v1642_v22 = vpop.f32.mrf.mxu0 }
 0x215   :  { %v1643_v23 = vpop.f32.mrf.mxu0 }
 0x227   :  { %v1597_v24 = vpop.f32.mrf.mxu1 }
 0x228   :  { %v1598_v36 = vadd.f32 %v1597_v24, %v580_v35 }
 0x229   :  { %v1599_v25 = vpop.f32.mrf.mxu1 }
 0x22a   :  { %v1600_v0 = vadd.f32 %v1599_v25, %v584_v34  ;;  %v1639_v40 = vadd.f32 %v1638_v21, %v1598_v36 }
 0x22b   :  { %v1601_v26 = vpop.f32.mrf.mxu1 }
 0x22c   :  { %v1641_v37 = vadd.f32 %v1640_v33, %v1600_v0  ;;  %v1728_v48 = vmax.f32 %v1639_v40, 0.0 }
 0x22d   :  { %v1602_v27 = vpop.f32.mrf.mxu1 }
 0x22e   :  { %v1729_v44 = vmax.f32 %v1641_v37, 0.0  ;;  %v1768_v56 = vmul.f32 %v1750_v49, %v1728_v48 }
 0x230   :  { %v1769_v53 = vmul.f32 %v1754_v45, %v1729_v44 }
 0x232   :  { %v1777_v32 = vadd.f32 %v1769_v53, %v1768_v56 }
 0x234   :  { %v1719_v28 = vpop.f32.mrf.mxu0 }
 0x236   :  { %v1721_v29 = vpop.f32.mrf.mxu0 }
 0x238   :  { %v1722_v14 = vpop.f32.mrf.mxu0 }
 0x23a   :  { %v1723_v30 = vpop.f32.mrf.mxu0 }
 0x247   :  { %v2071_v38 = vpop.f32.mrf.mxu1 }
 0x249   :  { %v2072_v41 = vpop.f32.mrf.mxu1 }
 0x24a   :  { %v2073_v43 = vadd.f32 %v2072_v41, %v2071_v38 }
 0x24b   :  { %v2074_v46 = vpop.f32.mrf.mxu1 }
 0x24c   :  { %v1680_v47 = vadd.f32 %v2073_v43, %v588_v39 }
 0x24d   :  { %v2075_v50 = vpop.f32.mrf.mxu1 }
 0x24e   :  { %v1720_v51 = vadd.f32 %v1719_v28, %v1680_v47 }
 0x250   :  { %v1730_v54 = vmax.f32 %v1720_v51, 0.0 }
 0x252   :  { %v1770_v57 = vmul.f32 %v1758_v52, %v1730_v54 }
 0x254   :  { %v1778_v58 = vsel %vm1772_vm1, %v1770_v57, 0.0 }
 0x255   :  { %v1779_v59 = vadd.f32 %v1778_v58, %v1777_v32 }
 0x257   :  { %1780 = vadd.xlane.f32.xlu0 %v1779_v59 }
 0x280   :  { %v1776_v5 = vpop.xlane.xlu0 %1775 }
 0x281   :  { %v1797_v6 = vadd.f32 %v1790_v2, %v1776_v5 }
 0x283   :  { %1802 = vperm.xlu1 %2090, %v1797_v6  }
 0x2e0   :  { %v1781_v8 = vpop.xlane.xlu0 %1780 }
 0x2e1   :  { %v1798_v9 = vadd.f32 %v1794_v7, %v1781_v8 }
 0x2e3   :  { %v1822_v1 = vsub.f32 %v1797_v6, %v1798_v9  ;;  %1805 = vperm.xlu0 %2091, %v1798_v9  }
 0x2e5   :  { %v1823_v10 = vand.u32 2147483647, %v1822_v1 }
 0x2e7   :  { %v1824_v11 = vmul.f32 0.5, %v1823_v10 }
 0x2e9   :  { %1827 = vperm.xlu1 %2090, %v1824_v11  }
 0x2fe   :  { %v1803_v13 = vpop.permute.xlu1 %1802 }
 0x2ff   :  { %v1812_v15 = vrot.slane %v1803_v13, %v1811_v4 }
 0x35e   :  { %v1806_v63 = vpop.permute.xlu0 %1805 }
 0x35f   :  { %v1816_v16 = vrot.slane %v1806_v63, %v1811_v4 }
 0x361   :  { %v1818_v3 = vsel %vm1817_vm2, %v1816_v16, %v1812_v15 }
 0x362   :  { %1821 = vst.msk [vmem:[#allocation10] sm:$0x3] %vm1820_vm3, %v1818_v3 }
 0x363   :  { %2395 = shalt.err (!%p2392_p10)
}
 0x364   :  { %1845 = dma.vmem_to_hbm [thread:$0]  %s1843_s5, 32, %s2637_s7, [#allocation4]   ;;  %v1828_v61 = vpop.permute.xlu1 %1827  ;;  %vm1834_vm4 = vcmask 57344  }
 0x365   :  { %v1832_v62 = vrot.slane %v1828_v61, %v1811_v4  ;;  %s2404_s19 = scalar_lea.vmem %s1853_s15, 16  ;;  %s2408_s1 = scalar_lea.vmem %s1853_s15, 32 }
 0x366   :  { %p2405_p11 = scmp.ne.s32.totalorder %s1853_s15, %s2404_s19  ;;  %p2409_p12 = scmp.lt.s32.totalorder %s1853_s15, %s1853_s15 }
 0x367   :  { %1835 = vst.msk [vmem:[#allocation11] sm:$0x1] %vm1834_vm4, %v1832_v62  ;;  %p2410_p13 = scmp.lt.s32.totalorder %s2408_s1, %s2404_s19 }
 0x369   :  { %p2411_p0 = por %p2410_p13, %p2409_p12 }
 0x36b   :  { %p2412_p1 = pnand %p2411_p0, %p2405_p11 }
 0x36d   :  { %2415 = shalt.err (!%p2412_p1)
}
 0x36e   :  { %1855 = dma.vmem_to_hbm [thread:$0]  %s1853_s15, 16, %s2638_s8, [#allocation12]  }
 0x36f   :  { %2430 = dma.done.wait [#allocation4], 32  }
 0x370   :  { %2431 = vsyncadd [#allocation4], 4294967264 }
 0x371   :  { %2432 = dma.done.wait [#allocation12], 16  }
 0x372   :  { %2433 = vsyncadd [#allocation12], 4294967280 }
 0x373   :  { %1862 = vsyncpa [#allocation3], 1 }
 0x374   :  { %1863 = vsyncpa [#allocation6], 1 }
 0x375   :  { %1864 = vsyncpa [#allocation9], 1 }
 0x376   :  { %1865 = vsyncpa [#allocation4], 1 }
 0x377   :  { %1866 = vsyncpa [#allocation12], 1 }

</bundles_post_ra>
